<compile_context>
chip_gen: v7x
topology: tpu7x:2x2x1
jax: 0.10.0
libtpu: 0.0.40
codegen_flags: <defaults>
</compile_context>

<pallas_src>
import functools

import jax
import jax.numpy as jnp
from jax.experimental import pallas as pl
from jax.experimental.pallas import tpu as pltpu

EPS = 1e-5          # PyTorch BatchNorm1d default eps
NEG_SLOPE = 0.2     # LeakyReLU(0.2)


def _leaky_relu(x):
    return jnp.where(x > 0, x, NEG_SLOPE * x)


def _round_up(n, m):
    return ((n + m - 1) // m) * m


def _pad_feature_dim(d):
    # v6e/v7x MXU is 2x256x256 — prefer 256 granules once the dim exceeds 128;
    # below that, 128 (lane granule, also the v5e MXU size) avoids excess padding.
    return _round_up(d, 256) if d > 128 else _round_up(d, 128)


def _choose_tb(B):
    """Batch tile size. Rank: minimal padding waste, then >=2 grid steps
    (v7x shards 'parallel' grid axes over its 2 TensorCores), then the
    largest tile (amortizes per-step overhead / DMA on v5e/v6e)."""
    if B <= 16:
        return _round_up(B, 8)
    half = min(512, _round_up((B + 1) // 2, 8))
    best_tb, best_key = None, None
    for tb in sorted({128, 256, 512, half}):
        b_pad = _round_up(B, tb)
        waste = b_pad - B
        steps = b_pad // tb
        key = (waste, 0 if steps >= 2 else 1, -tb)
        if best_key is None or key < best_key:
            best_key, best_tb = key, tb
    return best_tb


def _vmem_limit_bytes(TB, in_pad, hid_pad, weight_buffers):
    """Explicit scoped-VMEM budget: actual footprint + headroom, capped to
    ~75% of physical VMEM (64 MiB on v7x, 128 MiB on v5e/v6e)."""
    w_bytes = 2 * (2 * in_pad * hid_pad) * weight_buffers     # two bf16 weight mats
    bias_bytes = 4 * (in_pad + hid_pad) * weight_buffers      # f32 biases
    io_bytes = 2 * 2 * TB * in_pad * 4                        # x & out, double-buffered
    tmp_bytes = TB * (hid_pad + 2 * in_pad) * 4               # h / epilogue temporaries
    need = w_bytes + bias_bytes + io_bytes + tmp_bytes
    budget = int(need * 1.5) + (8 << 20)                      # compiler-scratch headroom
    try:
        cap = int(pltpu.get_tpu_info().vmem_capacity_bytes)
    except Exception:
        cap = 64 << 20                                        # smallest (v7x) — safe
    return max(32 << 20, min(budget, (cap * 3) // 4))


def residual_block_kernel(x_ref, w1_ref, b1_ref, w2_ref, b2_ref, o_ref):
    x = x_ref[...]                                            # (TB, in_pad) f32
    x_bf = x.astype(jnp.bfloat16)

    # Linear1 (BN1 folded) + bias + LeakyReLU — bf16 MXU operands, f32 accumulate.
    h = jnp.dot(x_bf, w1_ref[...], preferred_element_type=jnp.float32)
    h = _leaky_relu(h + b1_ref[...])

    # Linear2 (BN2 folded) + bias.
    y = jnp.dot(h.astype(jnp.bfloat16), w2_ref[...],
                preferred_element_type=jnp.float32)
    y = y + b2_ref[...]

    # Residual add + LeakyReLU, all f32 (v5e VPU has no bf16).
    o_ref[...] = _leaky_relu(x + y)


def _fold_bn(w, b, gamma, beta, rmean, rvar):
    """Fold eval-mode BatchNorm into a Linear layer's weight/bias.

    w: (in, out), b/gamma/beta/rmean/rvar: (1, out).
    Returns (w_folded, b_folded) with x @ w_f + b_f == BN(x @ w + b).
    """
    scale = gamma * jax.lax.rsqrt(rvar + EPS)                 # (1, out)
    w_f = w * scale
    b_f = (b - rmean) * scale + beta
    return w_f, b_f


def prepare_params(params):
    """One-time host-side prep: fold eval-mode BN into the Linears, zero-pad
    feature dims to MXU-friendly sizes, cast matmul weights to bf16.

    Call once and reuse the result; this keeps the per-forward path free of
    weight re-materialization / re-padding HBM traffic."""
    in_dim, hidden = params["w1"].shape
    in_pad = _pad_feature_dim(in_dim)
    hid_pad = _pad_feature_dim(hidden)

    w1f, b1f = _fold_bn(params["w1"], params["b1"], params["g1"],
                        params["beta1"], params["rm1"], params["rv1"])
    w2f, b2f = _fold_bn(params["w2"], params["b2"], params["g2"],
                        params["beta2"], params["rm2"], params["rv2"])

    w1p = jnp.pad(w1f, ((0, in_pad - in_dim), (0, hid_pad - hidden))
                  ).astype(jnp.bfloat16)
    b1p = jnp.pad(b1f, ((0, 0), (0, hid_pad - hidden)))       # stays f32
    w2p = jnp.pad(w2f, ((0, hid_pad - hidden), (0, in_pad - in_dim))
                  ).astype(jnp.bfloat16)
    b2p = jnp.pad(b2f, ((0, 0), (0, in_pad - in_dim)))        # stays f32

    return dict(w1=w1p, b1=b1p, w2=w2p, b2=b2p)


@functools.partial(jax.jit, static_argnames=("single_buffer_weights",))
def _residual_block_apply(x, w1p, b1p, w2p, b2p, *, single_buffer_weights=True):
    B, in_dim = x.shape
    in_pad, hid_pad = w1p.shape

    TB = _choose_tb(B)
    B_pad = _round_up(B, TB)
    grid = (B_pad // TB,)

    xp = jnp.pad(x, ((0, B_pad - B), (0, in_pad - in_dim)))

    if single_buffer_weights:
        resident_kwargs = dict(pipeline_mode=pl.Buffered(1))
        weight_buffers = 1
    else:
        resident_kwargs = {}
        weight_buffers = 2

    in_specs = [
        pl.BlockSpec((TB, in_pad), lambda i: (i, 0)),                       # x tile
        pl.BlockSpec((in_pad, hid_pad), lambda i: (0, 0), **resident_kwargs),  # w1
        pl.BlockSpec((1, hid_pad), lambda i: (0, 0), **resident_kwargs),       # b1
        pl.BlockSpec((hid_pad, in_pad), lambda i: (0, 0), **resident_kwargs),  # w2
        pl.BlockSpec((1, in_pad), lambda i: (0, 0), **resident_kwargs),        # b2
    ]
    out_spec = pl.BlockSpec((TB, in_pad), lambda i: (i, 0))

    flops = 2 * B_pad * in_pad * hid_pad * 2                  # two GEMMs
    bytes_accessed = (4 * 2 * B_pad * in_pad                  # x in + out (f32)
                      + 2 * 2 * in_pad * hid_pad              # two bf16 weights
                      + 4 * (in_pad + hid_pad))               # f32 biases

    out_pad = pl.pallas_call(
        residual_block_kernel,
        out_shape=jax.ShapeDtypeStruct((B_pad, in_pad), jnp.float32),
        grid=grid,
        in_specs=in_specs,
        out_specs=out_spec,
        compiler_params=pltpu.CompilerParams(
            dimension_semantics=("parallel",),
            vmem_limit_bytes=_vmem_limit_bytes(TB, in_pad, hid_pad, weight_buffers),
        ),
        cost_estimate=pl.CostEstimate(
            flops=flops, transcendentals=0, bytes_accessed=bytes_accessed),
    )(xp, w1p, b1p, w2p, b2p)

    return out_pad[:B, :in_dim]


_SINGLE_BUFFER_OK = None


def residual_block(x, prep):
    """x: (B, in_dim) float32; prep: output of prepare_params()."""
    global _SINGLE_BUFFER_OK
    args = (x, prep["w1"], prep["b1"], prep["w2"], prep["b2"])
    if _SINGLE_BUFFER_OK is None:
        try:
            out = _residual_block_apply(*args, single_buffer_weights=True)
            _SINGLE_BUFFER_OK = True
            return out
        except Exception:
            # Fallback for jax builds without pipeline_mode support on TPU
            # pallas_call; default double-buffering is used instead.
            _SINGLE_BUFFER_OK = False
    return _residual_block_apply(*args, single_buffer_weights=_SINGLE_BUFFER_OK)


def init_params(key, in_dim, hidden_dim):
    """Deterministic synthetic parameters matching nn.Module shapes.

    Linear weights stored transposed relative to PyTorch: (in, out).
    All 1-D BN/bias params kept as (1, N) for 2-D vreg layout.
    """
    ks = jax.random.split(key, 8)
    w1 = jax.random.normal(ks[0], (in_dim, hidden_dim), jnp.float32) * 0.1
    b1 = jax.random.normal(ks[1], (1, hidden_dim), jnp.float32) * 0.1
    w2 = jax.random.normal(ks[2], (hidden_dim, in_dim), jnp.float32) * 0.1
    b2 = jax.random.normal(ks[3], (1, in_dim), jnp.float32) * 0.1
    g1 = 1.0 + 0.1 * jax.random.normal(ks[4], (1, hidden_dim), jnp.float32)
    beta1 = 0.1 * jax.random.normal(ks[5], (1, hidden_dim), jnp.float32)
    rm1 = 0.1 * jax.random.normal(ks[6], (1, hidden_dim), jnp.float32)
    rv1 = 1.0 + 0.1 * jnp.abs(jax.random.normal(ks[7], (1, hidden_dim), jnp.float32))

    ks2 = jax.random.split(ks[0], 4)
    g2 = 1.0 + 0.1 * jax.random.normal(ks2[0], (1, in_dim), jnp.float32)
    beta2 = 0.1 * jax.random.normal(ks2[1], (1, in_dim), jnp.float32)
    rm2 = 0.1 * jax.random.normal(ks2[2], (1, in_dim), jnp.float32)
    rv2 = 1.0 + 0.1 * jnp.abs(jax.random.normal(ks2[3], (1, in_dim), jnp.float32))

    return dict(w1=w1, b1=b1, g1=g1, beta1=beta1, rm1=rm1, rv1=rv1,
                w2=w2, b2=b2, g2=g2, beta2=beta2, rm2=rm2, rv2=rv2)


def residual_block_ref(x, p):
    """Pure-JAX f32 reference (unfolded BN, same eval-mode semantics)."""
    h = x @ p["w1"] + p["b1"]
    h = (h - p["rm1"]) * jax.lax.rsqrt(p["rv1"] + EPS) * p["g1"] + p["beta1"]
    h = jnp.where(h > 0, h, NEG_SLOPE * h)
    y = h @ p["w2"] + p["b2"]
    y = (y - p["rm2"]) * jax.lax.rsqrt(p["rv2"] + EPS) * p["g2"] + p["beta2"]
    return jnp.where(x + y > 0, x + y, NEG_SLOPE * (x + y))


if __name__ == "__main__":
    B, IN_DIM, HIDDEN = 8, 32, 64
    key = jax.random.PRNGKey(0)
    kx, kp = jax.random.split(key)
    x = jax.random.normal(kx, (B, IN_DIM), jnp.float32)
    params = init_params(kp, IN_DIM, HIDDEN)

    prep = prepare_params(params)          # one-time fold / pad / bf16 cast
    out = residual_block(x, prep)
    out = jax.block_until_ready(out)

    ref = residual_block_ref(x, params)
    assert out.shape == (B, IN_DIM)
    # bf16 MXU operands -> relaxed tolerance vs the pure-f32 reference.
    assert jnp.allclose(out, ref, atol=2e-2, rtol=2e-2)
    print("KERNEL_OK")
</pallas_src>

<mosaic_0001>
module attributes {stable_mosaic.version = 11 : i64} {
  func.func @residual_block_kernel(%arg0: i32, %arg1: memref<8x128xf32, #tpu.memory_space<vmem>>, %arg2: memref<128x128xbf16, #tpu.memory_space<vmem>>, %arg3: memref<1x128xf32, #tpu.memory_space<vmem>>, %arg4: memref<128x128xbf16, #tpu.memory_space<vmem>>, %arg5: memref<1x128xf32, #tpu.memory_space<vmem>>, %arg6: memref<8x128xf32, #tpu.memory_space<vmem>>) attributes {dimension_semantics = [#tpu.dimension_semantics<parallel>], iteration_bounds = array<i64: 1>, scalar_prefetch = 0 : i64, scratch_operands = 0 : i64, tpu.core_type = #tpu.core_type<tc>, window_params = [{transform_indices = @transform_0, window_bounds = array<i64: 8, 128>}, {pipeline_mode = #tpu.pipeline_mode<synchronous>, transform_indices = @transform_1, window_bounds = array<i64: 128, 128>}, {pipeline_mode = #tpu.pipeline_mode<synchronous>, transform_indices = @transform_2, window_bounds = array<i64: 1, 128>}, {pipeline_mode = #tpu.pipeline_mode<synchronous>, transform_indices = @transform_3, window_bounds = array<i64: 128, 128>}, {pipeline_mode = #tpu.pipeline_mode<synchronous>, transform_indices = @transform_4, window_bounds = array<i64: 1, 128>}, {transform_indices = @transform_5, window_bounds = array<i64: 8, 128>}]} {
    %c0 = arith.constant 0 : index
    %c0_0 = arith.constant 0 : index
    %0 = vector.load %arg1[%c0, %c0_0] : memref<8x128xf32, #tpu.memory_space<vmem>>, vector<8x128xf32>
    %1 = arith.truncf %0 : vector<8x128xf32> to vector<8x128xbf16>
    %c0_1 = arith.constant 0 : index
    %c0_2 = arith.constant 0 : index
    %2 = vector.load %arg2[%c0_1, %c0_2] : memref<128x128xbf16, #tpu.memory_space<vmem>>, vector<128x128xbf16>
    %cst = arith.constant dense<0.000000e+00> : vector<8x128xf32>
    %3 = tpu.matmul %1, %2, %cst {dimension_numbers = #tpu.dot_dimension_numbers<[1], [0], [0], [1], [0, 0, 1, 1], [], []>} : vector<8x128xbf16>, vector<128x128xbf16>, vector<8x128xf32> -> vector<8x128xf32>
    %c0_3 = arith.constant 0 : index
    %c0_4 = arith.constant 0 : index
    %4 = vector.load %arg3[%c0_3, %c0_4] : memref<1x128xf32, #tpu.memory_space<vmem>>, vector<1x128xf32>
    %5 = vector.broadcast %4 : vector<1x128xf32> to vector<8x128xf32>
    %6 = arith.addf %3, %5 : vector<8x128xf32>
    %cst_5 = arith.constant 0.000000e+00 : f32
    %7 = vector.broadcast %cst_5 : f32 to vector<8x128xf32>
    %8 = arith.cmpf ogt, %6, %7 : vector<8x128xf32>
    %cst_6 = arith.constant 2.000000e-01 : f32
    %9 = vector.broadcast %cst_6 : f32 to vector<8x128xf32>
    %10 = arith.mulf %9, %6 : vector<8x128xf32>
    %11 = arith.select %8, %6, %10 : vector<8x128xi1>, vector<8x128xf32>
    %12 = arith.truncf %11 : vector<8x128xf32> to vector<8x128xbf16>
    %c0_7 = arith.constant 0 : index
    %c0_8 = arith.constant 0 : index
    %13 = vector.load %arg4[%c0_7, %c0_8] : memref<128x128xbf16, #tpu.memory_space<vmem>>, vector<128x128xbf16>
    %cst_9 = arith.constant dense<0.000000e+00> : vector<8x128xf32>
    %14 = tpu.matmul %12, %13, %cst_9 {dimension_numbers = #tpu.dot_dimension_numbers<[1], [0], [0], [1], [0, 0, 1, 1], [], []>} : vector<8x128xbf16>, vector<128x128xbf16>, vector<8x128xf32> -> vector<8x128xf32>
    %c0_10 = arith.constant 0 : index
    %c0_11 = arith.constant 0 : index
    %15 = vector.load %arg5[%c0_10, %c0_11] : memref<1x128xf32, #tpu.memory_space<vmem>>, vector<1x128xf32>
    %16 = vector.broadcast %15 : vector<1x128xf32> to vector<8x128xf32>
    %17 = arith.addf %14, %16 : vector<8x128xf32>
    %18 = arith.addf %0, %17 : vector<8x128xf32>
    %cst_12 = arith.constant 0.000000e+00 : f32
    %19 = vector.broadcast %cst_12 : f32 to vector<8x128xf32>
    %20 = arith.cmpf ogt, %18, %19 : vector<8x128xf32>
    %cst_13 = arith.constant 2.000000e-01 : f32
    %21 = vector.broadcast %cst_13 : f32 to vector<8x128xf32>
    %22 = arith.mulf %21, %18 : vector<8x128xf32>
    %23 = arith.select %20, %18, %22 : vector<8x128xi1>, vector<8x128xf32>
    %c0_14 = arith.constant 0 : index
    %c0_15 = arith.constant 0 : index
    %24 = vector.load %arg6[%c0_14, %c0_15] : memref<8x128xf32, #tpu.memory_space<vmem>>, vector<8x128xf32>
    tpu.vector_store %arg6[%c0_14, %c0_15], %23 {strides = array<i32>} : memref<8x128xf32, #tpu.memory_space<vmem>>, vector<8x128xf32>,
    return
  }
  func.func @transform_0(%arg0: i32) -> (i32, i32) {
    %c0_i32 = arith.constant 0 : i32
    %c0_i32_0 = arith.constant 0 : i32
    return %arg0, %c0_i32 : i32, i32
  }
  func.func @transform_1(%arg0: i32) -> (i32, i32) {
    %c0_i32 = arith.constant 0 : i32
    %c0_i32_0 = arith.constant 0 : i32
    %c0_i32_1 = arith.constant 0 : i32
    return %c0_i32, %c0_i32_0 : i32, i32
  }
  func.func @transform_2(%arg0: i32) -> (i32, i32) {
    %c0_i32 = arith.constant 0 : i32
    %c0_i32_0 = arith.constant 0 : i32
    %c0_i32_1 = arith.constant 0 : i32
    return %c0_i32, %c0_i32_0 : i32, i32
  }
  func.func @transform_3(%arg0: i32) -> (i32, i32) {
    %c0_i32 = arith.constant 0 : i32
    %c0_i32_0 = arith.constant 0 : i32
    %c0_i32_1 = arith.constant 0 : i32
    return %c0_i32, %c0_i32_0 : i32, i32
  }
  func.func @transform_4(%arg0: i32) -> (i32, i32) {
    %c0_i32 = arith.constant 0 : i32
    %c0_i32_0 = arith.constant 0 : i32
    %c0_i32_1 = arith.constant 0 : i32
    return %c0_i32, %c0_i32_0 : i32, i32
  }
  func.func @transform_5(%arg0: i32) -> (i32, i32) {
    %c0_i32 = arith.constant 0 : i32
    %c0_i32_0 = arith.constant 0 : i32
    return %arg0, %c0_i32 : i32, i32
  }
}

module attributes {stable_mosaic.version = 11 : i64} {
  func.func @residual_block_kernel(%arg0: i32, %arg1: memref<8x128xf32, #tpu.memory_space<vmem>>, %arg2: memref<128x128xbf16, #tpu.memory_space<vmem>>, %arg3: memref<1x128xf32, #tpu.memory_space<vmem>>, %arg4: memref<128x128xbf16, #tpu.memory_space<vmem>>, %arg5: memref<1x128xf32, #tpu.memory_space<vmem>>, %arg6: memref<8x128xf32, #tpu.memory_space<vmem>>) attributes {dimension_semantics = [#tpu.dimension_semantics<parallel>], iteration_bounds = array<i64: 1>, scalar_prefetch = 0 : i64, scratch_operands = 0 : i64, tpu.core_type = #tpu.core_type<tc>, window_params = [{transform_indices = @transform_0, window_bounds = array<i64: 8, 128>}, {pipeline_mode = #tpu.pipeline_mode<synchronous>, transform_indices = @transform_1, window_bounds = array<i64: 128, 128>}, {pipeline_mode = #tpu.pipeline_mode<synchronous>, transform_indices = @transform_2, window_bounds = array<i64: 1, 128>}, {pipeline_mode = #tpu.pipeline_mode<synchronous>, transform_indices = @transform_3, window_bounds = array<i64: 128, 128>}, {pipeline_mode = #tpu.pipeline_mode<synchronous>, transform_indices = @transform_4, window_bounds = array<i64: 1, 128>}, {transform_indices = @transform_5, window_bounds = array<i64: 8, 128>}]} {
    %c0 = arith.constant 0 : index
    %c0_0 = arith.constant 0 : index
    %0 = vector.load %arg1[%c0, %c0_0] : memref<8x128xf32, #tpu.memory_space<vmem>>, vector<8x128xf32>
    %1 = arith.truncf %0 : vector<8x128xf32> to vector<8x128xbf16>
    %c0_1 = arith.constant 0 : index
    %c0_2 = arith.constant 0 : index
    %2 = vector.load %arg2[%c0_1, %c0_2] : memref<128x128xbf16, #tpu.memory_space<vmem>>, vector<128x128xbf16>
    %cst = arith.constant dense<0.000000e+00> : vector<8x128xf32>
    %3 = tpu.matmul %1, %2, %cst {dimension_numbers = #tpu.dot_dimension_numbers<[1], [0], [0], [1], [0, 0, 1, 1], [], []>} : vector<8x128xbf16>, vector<128x128xbf16>, vector<8x128xf32> -> vector<8x128xf32>
    %c0_3 = arith.constant 0 : index
    %c0_4 = arith.constant 0 : index
    %4 = vector.load %arg3[%c0_3, %c0_4] : memref<1x128xf32, #tpu.memory_space<vmem>>, vector<1x128xf32>
    %5 = vector.broadcast %4 : vector<1x128xf32> to vector<8x128xf32>
    %6 = arith.addf %3, %5 : vector<8x128xf32>
    %cst_5 = arith.constant 0.000000e+00 : f32
    %7 = vector.broadcast %cst_5 : f32 to vector<8x128xf32>
    %8 = arith.cmpf ogt, %6, %7 : vector<8x128xf32>
    %cst_6 = arith.constant 2.000000e-01 : f32
    %9 = vector.broadcast %cst_6 : f32 to vector<8x128xf32>
    %10 = arith.mulf %9, %6 : vector<8x128xf32>
    %11 = arith.select %8, %6, %10 : vector<8x128xi1>, vector<8x128xf32>
    %12 = arith.truncf %11 : vector<8x128xf32> to vector<8x128xbf16>
    %c0_7 = arith.constant 0 : index
    %c0_8 = arith.constant 0 : index
    %13 = vector.load %arg4[%c0_7, %c0_8] : memref<128x128xbf16, #tpu.memory_space<vmem>>, vector<128x128xbf16>
    %cst_9 = arith.constant dense<0.000000e+00> : vector<8x128xf32>
    %14 = tpu.matmul %12, %13, %cst_9 {dimension_numbers = #tpu.dot_dimension_numbers<[1], [0], [0], [1], [0, 0, 1, 1], [], []>} : vector<8x128xbf16>, vector<128x128xbf16>, vector<8x128xf32> -> vector<8x128xf32>
    %c0_10 = arith.constant 0 : index
    %c0_11 = arith.constant 0 : index
    %15 = vector.load %arg5[%c0_10, %c0_11] : memref<1x128xf32, #tpu.memory_space<vmem>>, vector<1x128xf32>
    %16 = vector.broadcast %15 : vector<1x128xf32> to vector<8x128xf32>
    %17 = arith.addf %14, %16 : vector<8x128xf32>
    %18 = arith.addf %0, %17 : vector<8x128xf32>
    %cst_12 = arith.constant 0.000000e+00 : f32
    %19 = vector.broadcast %cst_12 : f32 to vector<8x128xf32>
    %20 = arith.cmpf ogt, %18, %19 : vector<8x128xf32>
    %cst_13 = arith.constant 2.000000e-01 : f32
    %21 = vector.broadcast %cst_13 : f32 to vector<8x128xf32>
    %22 = arith.mulf %21, %18 : vector<8x128xf32>
    %23 = arith.select %20, %18, %22 : vector<8x128xi1>, vector<8x128xf32>
    %c0_14 = arith.constant 0 : index
    %c0_15 = arith.constant 0 : index
    %24 = vector.load %arg6[%c0_14, %c0_15] : memref<8x128xf32, #tpu.memory_space<vmem>>, vector<8x128xf32>
    tpu.vector_store %arg6[%c0_14, %c0_15], %23 {strides = array<i32>} : memref<8x128xf32, #tpu.memory_space<vmem>>, vector<8x128xf32>,
    return
  }
  func.func @transform_0(%arg0: i32) -> (i32, i32) {
    %c0_i32 = arith.constant 0 : i32
    %c0_i32_0 = arith.constant 0 : i32
    return %arg0, %c0_i32 : i32, i32
  }
  func.func @transform_1(%arg0: i32) -> (i32, i32) {
    %c0_i32 = arith.constant 0 : i32
    %c0_i32_0 = arith.constant 0 : i32
    %c0_i32_1 = arith.constant 0 : i32
    return %c0_i32, %c0_i32_0 : i32, i32
  }
  func.func @transform_2(%arg0: i32) -> (i32, i32) {
    %c0_i32 = arith.constant 0 : i32
    %c0_i32_0 = arith.constant 0 : i32
    %c0_i32_1 = arith.constant 0 : i32
    return %c0_i32, %c0_i32_0 : i32, i32
  }
  func.func @transform_3(%arg0: i32) -> (i32, i32) {
    %c0_i32 = arith.constant 0 : i32
    %c0_i32_0 = arith.constant 0 : i32
    %c0_i32_1 = arith.constant 0 : i32
    return %c0_i32, %c0_i32_0 : i32, i32
  }
  func.func @transform_4(%arg0: i32) -> (i32, i32) {
    %c0_i32 = arith.constant 0 : i32
    %c0_i32_0 = arith.constant 0 : i32
    %c0_i32_1 = arith.constant 0 : i32
    return %c0_i32, %c0_i32_0 : i32, i32
  }
  func.func @transform_5(%arg0: i32) -> (i32, i32) {
    %c0_i32 = arith.constant 0 : i32
    %c0_i32_0 = arith.constant 0 : i32
    return %arg0, %c0_i32 : i32, i32
  }
}

</mosaic_0001>

<bundles_post_ra>
// kernel: _residual_block_apply.1
= control target key start
LH: loop header
LB: loop body
LE: loop exit
PB: predicated region body
PF: predicated region fallthrough
CT: control target
= control target key end

     0   :  { %10 = vsyncpa [#allocation3], 0  ;;  %s552_s0 = inlined_call_operand.vmem [shape: f32[8,128], index: 0, kind: input, shape index: {}]   ;;  %s553_s1 = inlined_call_operand.hbm [shape: bf16[128,128], index: 1, kind: input, shape index: {}]   ;;  %s554_s2 = inlined_call_operand.vmem [shape: f32[1,128], index: 2, kind: input, shape index: {}]   ;;  %s555_s3 = inlined_call_operand.hbm [shape: bf16[128,128], index: 3, kind: input, shape index: {}]   ;;  %s556_s4 = inlined_call_operand.vmem [shape: f32[1,128], index: 4, kind: input, shape index: {}]   ;;  %s557_s5 = inlined_call_operand.hbm [shape: f32[8,128], index: 5, kind: output, shape index: {}]  }
   0x1   :  { %11 = vsyncpa [#allocation6], 0 }
   0x2   :  { %12 = vsyncpa [#allocation4], 0  ;;  %s470_s18 = smov [#allocation2]   ;;  %s398_s22 = scalar_lea.hbm %s553_s1, 1024 }
   0x3   :  { %s20_s19 = sshll.u32 %s470_s18, 4  ;;  %p399_p0 = scmp.ne.s32.totalorder %s553_s1, %s398_s22  ;;  %s21_s19 = int_to_ptr.vmem [resolvable:$true] %s20_s19 }
   0x4   :  { %p402_p1 = scmp.lt.u32.totalorder %s398_s22, %s553_s1 }
   0x6   :  { %p404_p2 = pnand %p402_p1, %p399_p0 }
   0x8   :  { %407 = shalt.err (!%p404_p2)
}
   0x9   :  { %s408_s27 = scalar_lea.vmem %s21_s19, 1024  ;;  %p413_p4 = scmp.lt.s32.totalorder %s21_s19, %s21_s19 }
   0xa   :  { %p409_p3 = scmp.ne.s32.totalorder %s21_s19, %s408_s27  ;;  %p414_p5 = scmp.lt.s32.totalorder %s408_s27, %s408_s27 }
   0xc   :  { %p415_p6 = por %p414_p5, %p413_p4 }
   0xe   :  { %p416_p7 = pnand %p415_p6, %p409_p3 }
  0x10   :  { %419 = shalt.err (!%p416_p7)
}
  0x11   :  { %s471_s28 = smov 64   ;;  %s472_s29 = smov 4  }
  0x12   :  { %26 = dma.hbm_to_vmem [thread:$0]  %s553_s1, 1024, %s21_s19, [#allocation3], %s471_s28, %s471_s28, %s472_s29  }
  0x13   :  { %s473_s7 = smov [#allocation5]   ;;  %s420_s11 = scalar_lea.hbm %s555_s3, 1024 }
  0x14   :  { %s34_s8 = sshll.u32 %s473_s7, 4  ;;  %p421_p8 = scmp.ne.s32.totalorder %s555_s3, %s420_s11  ;;  %s35_s8 = int_to_ptr.vmem [resolvable:$true] %s34_s8 }
  0x15   :  { %p424_p9 = scmp.lt.u32.totalorder %s420_s11, %s555_s3 }
  0x17   :  { %p426_p10 = pnand %p424_p9, %p421_p8 }
  0x19   :  { %429 = shalt.err (!%p426_p10)
}
  0x1a   :  { %s430_s16 = scalar_lea.vmem %s35_s8, 1024  ;;  %p435_p12 = scmp.lt.s32.totalorder %s35_s8, %s35_s8 }
  0x1b   :  { %p431_p11 = scmp.ne.s32.totalorder %s35_s8, %s430_s16  ;;  %p436_p13 = scmp.lt.s32.totalorder %s430_s16, %s430_s16 }
  0x1d   :  { %p437_p0 = por %p436_p13, %p435_p12 }
  0x1f   :  { %p438_p1 = pnand %p437_p0, %p431_p11 }
  0x21   :  { %441 = shalt.err (!%p438_p1)
}
  0x22   :  { %40 = dma.hbm_to_vmem [thread:$0]  %s555_s3, 1024, %s35_s8, [#allocation6], %s471_s28, %s471_s28, %s472_s29  }
  0x23   :  { %464 = dma.done.wait [#allocation3], 1024  }
  0x24   :  { %465 = vsyncadd [#allocation3], 4294966272 }
  0x25   :  { %466 = dma.done.wait [#allocation6], 1024  }
  0x26   :  { %467 = vsyncadd [#allocation6], 4294966272  ;;  %v474_v0 = vmov 0.0   ;;  %vm475_vm0 = vmmov 0   ;;  %v382_v1 = vld [vmem:[#allocation2] sm:$0xff]   ;;  %v383_v2 = vld [vmem:[#allocation2 + $0x8] sm:$0xff]  }
  0x27   :  { %335 = vmatprep.subr.bf16.mxu0 %v474_v0  ;;  %351 = vmatprep.mubr.msk.bf16.mxu0 %vm475_vm0, %v474_v0  ;;  %v384_v3 = vld [vmem:[#allocation2 + $0x10] sm:$0xff]   ;;  %v390_v4 = vld [vmem:[#allocation5] sm:$0xff]   ;;  %v385_v5 = vld [vmem:[#allocation2 + $0x18] sm:$0xff]  }
  0x28   :  { %355 = vmatprep.subr.bf16.mxu1 %v474_v0  ;;  %371 = vmatprep.mubr.msk.bf16.mxu1 %vm475_vm0, %v474_v0  ;;  %v391_v6 = vld [vmem:[#allocation5 + $0x8] sm:$0xff]   ;;  %v386_v7 = vld [vmem:[#allocation2 + $0x20] sm:$0xff]   ;;  %v392_v8 = vld [vmem:[#allocation5 + $0x10] sm:$0xff]  }
  0x29   :  { %336 = vmatpush3.bf16.msra.mxu0 %v382_v1  ;;  %356 = vmatpush3.bf16.msra.mxu1 %v390_v4  ;;  %v387_v9 = vld [vmem:[#allocation2 + $0x28] sm:$0xff]   ;;  %v393_v10 = vld [vmem:[#allocation5 + $0x18] sm:$0xff]   ;;  %v388_v11 = vld [vmem:[#allocation2 + $0x30] sm:$0xff]  }
  0x2a   :  { %337 = vmatprep.subr.bf16.mxu0 %v474_v0  ;;  %357 = vmatprep.subr.bf16.mxu1 %v474_v0  ;;  %v394_v12 = vld [vmem:[#allocation5 + $0x20] sm:$0xff]   ;;  %v389_v13 = vld [vmem:[#allocation2 + $0x38] sm:$0xff]   ;;  %v395_v15 = vld [vmem:[#allocation5 + $0x28] sm:$0xff]  }
  0x2b   :  { %v50_v14 = vld [vmem:[%s552_s0] sm:$0xff]  ;;  %v396_v17 = vld [vmem:[#allocation5 + $0x30] sm:$0xff]  }
  0x2c   :  { %v51_v16 = vpack.c.bf16 %v50_v14, %v50_v14  ;;  %v397_v18 = vld [vmem:[#allocation5 + $0x38] sm:$0xff]  }
  0x2d   :  { %338 = vmatpush3.bf16.msra.mxu0 %v383_v2  ;;  %358 = vmatpush3.bf16.msra.mxu1 %v391_v6  ;;  %v299_v19 = vld [vmem:[%s554_s2] ss:$0 sm:$0xff]  ;;  %s476_s2 = smov [#allocation7]  }
  0x2e   :  { %339 = vmatprep.subr.bf16.mxu0 %v474_v0  ;;  %359 = vmatprep.subr.bf16.mxu1 %v474_v0  ;;  %v308_v28 = vld [vmem:[%s556_s4] ss:$0 sm:$0xff]  ;;  %s289_s22 = sshll.u32 %s476_s2, 4  ;;  %s290_s22 = int_to_ptr.vmem [resolvable:$true] %s289_s22 }
  0x2f   :  { %s442_s23 = scalar_lea.vmem %s290_s22, 128  ;;  %p447_p3 = scmp.lt.s32.totalorder %s290_s22, %s290_s22 }
  0x30   :  { %p443_p2 = scmp.ne.s32.totalorder %s290_s22, %s442_s23  ;;  %p448_p4 = scmp.lt.s32.totalorder %s442_s23, %s442_s23 }
  0x31   :  { %340 = vmatpush3.bf16.msra.mxu0 %v384_v3  ;;  %360 = vmatpush3.bf16.msra.mxu1 %v392_v8 }
  0x32   :  { %341 = vmatprep.subr.bf16.mxu0 %v474_v0  ;;  %361 = vmatprep.subr.bf16.mxu1 %v474_v0  ;;  %p449_p5 = por %p448_p4, %p447_p3 }
  0x34   :  { %p450_p6 = pnand %p449_p5, %p443_p2 }
  0x35   :  { %342 = vmatpush3.bf16.msra.mxu0 %v385_v5  ;;  %362 = vmatpush3.bf16.msra.mxu1 %v393_v10 }
  0x36   :  { %343 = vmatprep.subr.bf16.mxu0 %v474_v0  ;;  %363 = vmatprep.subr.bf16.mxu1 %v474_v0 }
  0x39   :  { %344 = vmatpush3.bf16.msra.mxu0 %v386_v7  ;;  %364 = vmatpush3.bf16.msra.mxu1 %v394_v12 }
  0x3a   :  { %345 = vmatprep.subr.bf16.mxu0 %v474_v0  ;;  %365 = vmatprep.subr.bf16.mxu1 %v474_v0 }
  0x3d   :  { %346 = vmatpush3.bf16.msra.mxu0 %v387_v9  ;;  %366 = vmatpush3.bf16.msra.mxu1 %v395_v15 }
  0x3e   :  { %347 = vmatprep.subr.bf16.mxu0 %v474_v0  ;;  %367 = vmatprep.subr.bf16.mxu1 %v474_v0 }
  0x41   :  { %348 = vmatpush3.bf16.msra.mxu0 %v388_v11  ;;  %368 = vmatpush3.bf16.msra.mxu1 %v396_v17 }
  0x42   :  { %349 = vmatprep.subr.bf16.mxu0 %v474_v0  ;;  %369 = vmatprep.subr.bf16.mxu1 %v474_v0 }
  0x45   :  { %350 = vmatpush3.bf16.msra.mxu0 %v389_v13  ;;  %370 = vmatpush3.bf16.msra.mxu1 %v397_v18 }
  0x48   :  { %352 = vmatmul.mubr.bf16.vlgmr.msra.gmra.mrb[0].mxu0 %v51_v16 }
 0x11b   :  { %v157_v20 = vpop.f32.mrb[0].mxu0 }
 0x11c   :  { %v158_v21 = vadd.f32 %v299_v19, %v157_v20  ;;  %v353_v22 = vpop.f32.mrb[1].mxu0 }
 0x11d   :  { %v160_v23 = vpop.f32.mrb[2].mxu0 }
 0x11e   :  { %vm163_vm1 = vcmp.gt.f32.partialorder %v158_v21, 0.0  ;;  %v164_v24 = vmul.f32 0.2, %v158_v21  ;;  %v354_v25 = vpop.f32.mrb[3].mxu0 }
 0x120   :  { %v165_v26 = vsel %vm163_vm1, %v158_v21, %v164_v24 }
 0x121   :  { %v166_v27 = vpack.c.bf16 %v165_v26, %v165_v26 }
 0x123   :  { %372 = vmatmul.mubr.bf16.vlgmr.msra.gmra.mrb[0].mxu1 %v166_v27 }
 0x1f6   :  { %v272_v29 = vpop.f32.mrb[0].mxu1 }
 0x1f7   :  { %v273_v30 = vadd.f32 %v308_v28, %v272_v29  ;;  %v373_v31 = vpop.f32.mrb[1].mxu1 }
 0x1f8   :  { %v275_v32 = vpop.f32.mrb[2].mxu1 }
 0x1f9   :  { %v278_v33 = vadd.f32 %v273_v30, %v50_v14  ;;  %v374_v34 = vpop.f32.mrb[3].mxu1 }
 0x1fb   :  { %v280_v35 = vmul.f32 0.2, %v278_v33  ;;  %vm279_vm2 = vcmp.gt.f32.partialorder %v278_v33, 0.0 }
 0x1fd   :  { %v281_v36 = vsel %vm279_vm2, %v278_v33, %v280_v35 }
 0x1fe   :  { %282 = vst [vmem:[#allocation7] sm:$0xff] %v281_v36 }
 0x1ff   :  { %453 = shalt.err (!%p450_p6)
}
 0x200   :  { %s454_s25 = scalar_lea.hbm %s557_s5, 128 }
 0x201   :  { %p455_p7 = scmp.ne.s32.totalorder %s557_s5, %s454_s25  ;;  %p458_p8 = scmp.lt.u32.totalorder %s454_s25, %s557_s5 }
 0x203   :  { %p460_p9 = pnand %p458_p8, %p455_p7 }
 0x205   :  { %463 = shalt.err (!%p460_p9)
}
 0x206   :  { %292 = dma.vmem_to_hbm [thread:$0]  %s290_s22, 128, %s557_s5, [#allocation4]  }
 0x207   :  { %468 = dma.done.wait [#allocation4], 128  }
 0x208   :  { %469 = vsyncadd [#allocation4], 4294967168 }
 0x209   :  { %296 = vsyncpa [#allocation3], 1 }
 0x20a   :  { %297 = vsyncpa [#allocation6], 1 }
 0x20b   :  { %298 = vsyncpa [#allocation4], 1 }

// kernel: _residual_block_apply.1
= control target key start
LH: loop header
LB: loop body
LE: loop exit
PB: predicated region body
PF: predicated region fallthrough
CT: control target
= control target key end

     0   :  { %10 = vsyncpa [#allocation3], 0  ;;  %s552_s0 = inlined_call_operand.vmem [shape: f32[8,128], index: 0, kind: input, shape index: {}]   ;;  %s553_s1 = inlined_call_operand.hbm [shape: bf16[128,128], index: 1, kind: input, shape index: {}]   ;;  %s554_s2 = inlined_call_operand.vmem [shape: f32[1,128], index: 2, kind: input, shape index: {}]   ;;  %s555_s3 = inlined_call_operand.hbm [shape: bf16[128,128], index: 3, kind: input, shape index: {}]   ;;  %s556_s4 = inlined_call_operand.vmem [shape: f32[1,128], index: 4, kind: input, shape index: {}]   ;;  %s557_s5 = inlined_call_operand.hbm [shape: f32[8,128], index: 5, kind: output, shape index: {}]  }
   0x1   :  { %11 = vsyncpa [#allocation6], 0 }
   0x2   :  { %12 = vsyncpa [#allocation4], 0  ;;  %s470_s18 = smov [#allocation2]   ;;  %s398_s22 = scalar_lea.hbm %s553_s1, 1024 }
   0x3   :  { %s20_s19 = sshll.u32 %s470_s18, 4  ;;  %p399_p0 = scmp.ne.s32.totalorder %s553_s1, %s398_s22  ;;  %s21_s19 = int_to_ptr.vmem [resolvable:$true] %s20_s19 }
   0x4   :  { %p402_p1 = scmp.lt.u32.totalorder %s398_s22, %s553_s1 }
   0x6   :  { %p404_p2 = pnand %p402_p1, %p399_p0 }
   0x8   :  { %407 = shalt.err (!%p404_p2)
}
   0x9   :  { %s408_s27 = scalar_lea.vmem %s21_s19, 1024  ;;  %p413_p4 = scmp.lt.s32.totalorder %s21_s19, %s21_s19 }
   0xa   :  { %p409_p3 = scmp.ne.s32.totalorder %s21_s19, %s408_s27  ;;  %p414_p5 = scmp.lt.s32.totalorder %s408_s27, %s408_s27 }
   0xc   :  { %p415_p6 = por %p414_p5, %p413_p4 }
   0xe   :  { %p416_p7 = pnand %p415_p6, %p409_p3 }
  0x10   :  { %419 = shalt.err (!%p416_p7)
}
  0x11   :  { %s471_s28 = smov 64   ;;  %s472_s29 = smov 4  }
  0x12   :  { %26 = dma.hbm_to_vmem [thread:$0]  %s553_s1, 1024, %s21_s19, [#allocation3], %s471_s28, %s471_s28, %s472_s29  }
  0x13   :  { %s473_s7 = smov [#allocation5]   ;;  %s420_s11 = scalar_lea.hbm %s555_s3, 1024 }
  0x14   :  { %s34_s8 = sshll.u32 %s473_s7, 4  ;;  %p421_p8 = scmp.ne.s32.totalorder %s555_s3, %s420_s11  ;;  %s35_s8 = int_to_ptr.vmem [resolvable:$true] %s34_s8 }
  0x15   :  { %p424_p9 = scmp.lt.u32.totalorder %s420_s11, %s555_s3 }
  0x17   :  { %p426_p10 = pnand %p424_p9, %p421_p8 }
  0x19   :  { %429 = shalt.err (!%p426_p10)
}
  0x1a   :  { %s430_s16 = scalar_lea.vmem %s35_s8, 1024  ;;  %p435_p12 = scmp.lt.s32.totalorder %s35_s8, %s35_s8 }
  0x1b   :  { %p431_p11 = scmp.ne.s32.totalorder %s35_s8, %s430_s16  ;;  %p436_p13 = scmp.lt.s32.totalorder %s430_s16, %s430_s16 }
  0x1d   :  { %p437_p0 = por %p436_p13, %p435_p12 }
  0x1f   :  { %p438_p1 = pnand %p437_p0, %p431_p11 }
  0x21   :  { %441 = shalt.err (!%p438_p1)
}
  0x22   :  { %40 = dma.hbm_to_vmem [thread:$0]  %s555_s3, 1024, %s35_s8, [#allocation6], %s471_s28, %s471_s28, %s472_s29  }
  0x23   :  { %464 = dma.done.wait [#allocation3], 1024  }
  0x24   :  { %465 = vsyncadd [#allocation3], 4294966272 }
  0x25   :  { %466 = dma.done.wait [#allocation6], 1024  }
  0x26   :  { %467 = vsyncadd [#allocation6], 4294966272  ;;  %v474_v0 = vmov 0.0   ;;  %vm475_vm0 = vmmov 0   ;;  %v382_v1 = vld [vmem:[#allocation2] sm:$0xff]   ;;  %v383_v2 = vld [vmem:[#allocation2 + $0x8] sm:$0xff]  }
  0x27   :  { %335 = vmatprep.subr.bf16.mxu0 %v474_v0  ;;  %351 = vmatprep.mubr.msk.bf16.mxu0 %vm475_vm0, %v474_v0  ;;  %v384_v3 = vld [vmem:[#allocation2 + $0x10] sm:$0xff]   ;;  %v390_v4 = vld [vmem:[#allocation5] sm:$0xff]   ;;  %v385_v5 = vld [vmem:[#allocation2 + $0x18] sm:$0xff]  }
  0x28   :  { %355 = vmatprep.subr.bf16.mxu1 %v474_v0  ;;  %371 = vmatprep.mubr.msk.bf16.mxu1 %vm475_vm0, %v474_v0  ;;  %v391_v6 = vld [vmem:[#allocation5 + $0x8] sm:$0xff]   ;;  %v386_v7 = vld [vmem:[#allocation2 + $0x20] sm:$0xff]   ;;  %v392_v8 = vld [vmem:[#allocation5 + $0x10] sm:$0xff]  }
  0x29   :  { %336 = vmatpush3.bf16.msra.mxu0 %v382_v1  ;;  %356 = vmatpush3.bf16.msra.mxu1 %v390_v4  ;;  %v387_v9 = vld [vmem:[#allocation2 + $0x28] sm:$0xff]   ;;  %v393_v10 = vld [vmem:[#allocation5 + $0x18] sm:$0xff]   ;;  %v388_v11 = vld [vmem:[#allocation2 + $0x30] sm:$0xff]  }
  0x2a   :  { %337 = vmatprep.subr.bf16.mxu0 %v474_v0  ;;  %357 = vmatprep.subr.bf16.mxu1 %v474_v0  ;;  %v394_v12 = vld [vmem:[#allocation5 + $0x20] sm:$0xff]   ;;  %v389_v13 = vld [vmem:[#allocation2 + $0x38] sm:$0xff]   ;;  %v395_v15 = vld [vmem:[#allocation5 + $0x28] sm:$0xff]  }
  0x2b   :  { %v50_v14 = vld [vmem:[%s552_s0] sm:$0xff]  ;;  %v396_v17 = vld [vmem:[#allocation5 + $0x30] sm:$0xff]  }
  0x2c   :  { %v51_v16 = vpack.c.bf16 %v50_v14, %v50_v14  ;;  %v397_v18 = vld [vmem:[#allocation5 + $0x38] sm:$0xff]  }
  0x2d   :  { %338 = vmatpush3.bf16.msra.mxu0 %v383_v2  ;;  %358 = vmatpush3.bf16.msra.mxu1 %v391_v6  ;;  %v299_v19 = vld [vmem:[%s554_s2] ss:$0 sm:$0xff]  ;;  %s476_s2 = smov [#allocation7]  }
  0x2e   :  { %339 = vmatprep.subr.bf16.mxu0 %v474_v0  ;;  %359 = vmatprep.subr.bf16.mxu1 %v474_v0  ;;  %v308_v28 = vld [vmem:[%s556_s4] ss:$0 sm:$0xff]  ;;  %s289_s22 = sshll.u32 %s476_s2, 4  ;;  %s290_s22 = int_to_ptr.vmem [resolvable:$true] %s289_s22 }
  0x2f   :  { %s442_s23 = scalar_lea.vmem %s290_s22, 128  ;;  %p447_p3 = scmp.lt.s32.totalorder %s290_s22, %s290_s22 }
  0x30   :  { %p443_p2 = scmp.ne.s32.totalorder %s290_s22, %s442_s23  ;;  %p448_p4 = scmp.lt.s32.totalorder %s442_s23, %s442_s23 }
  0x31   :  { %340 = vmatpush3.bf16.msra.mxu0 %v384_v3  ;;  %360 = vmatpush3.bf16.msra.mxu1 %v392_v8 }
  0x32   :  { %341 = vmatprep.subr.bf16.mxu0 %v474_v0  ;;  %361 = vmatprep.subr.bf16.mxu1 %v474_v0  ;;  %p449_p5 = por %p448_p4, %p447_p3 }
  0x34   :  { %p450_p6 = pnand %p449_p5, %p443_p2 }
  0x35   :  { %342 = vmatpush3.bf16.msra.mxu0 %v385_v5  ;;  %362 = vmatpush3.bf16.msra.mxu1 %v393_v10 }
  0x36   :  { %343 = vmatprep.subr.bf16.mxu0 %v474_v0  ;;  %363 = vmatprep.subr.bf16.mxu1 %v474_v0 }
  0x39   :  { %344 = vmatpush3.bf16.msra.mxu0 %v386_v7  ;;  %364 = vmatpush3.bf16.msra.mxu1 %v394_v12 }
  0x3a   :  { %345 = vmatprep.subr.bf16.mxu0 %v474_v0  ;;  %365 = vmatprep.subr.bf16.mxu1 %v474_v0 }
  0x3d   :  { %346 = vmatpush3.bf16.msra.mxu0 %v387_v9  ;;  %366 = vmatpush3.bf16.msra.mxu1 %v395_v15 }
  0x3e   :  { %347 = vmatprep.subr.bf16.mxu0 %v474_v0  ;;  %367 = vmatprep.subr.bf16.mxu1 %v474_v0 }
  0x41   :  { %348 = vmatpush3.bf16.msra.mxu0 %v388_v11  ;;  %368 = vmatpush3.bf16.msra.mxu1 %v396_v17 }
  0x42   :  { %349 = vmatprep.subr.bf16.mxu0 %v474_v0  ;;  %369 = vmatprep.subr.bf16.mxu1 %v474_v0 }
  0x45   :  { %350 = vmatpush3.bf16.msra.mxu0 %v389_v13  ;;  %370 = vmatpush3.bf16.msra.mxu1 %v397_v18 }
  0x48   :  { %352 = vmatmul.mubr.bf16.vlgmr.msra.gmra.mrb[0].mxu0 %v51_v16 }
 0x11b   :  { %v157_v20 = vpop.f32.mrb[0].mxu0 }
 0x11c   :  { %v158_v21 = vadd.f32 %v299_v19, %v157_v20  ;;  %v353_v22 = vpop.f32.mrb[1].mxu0 }
 0x11d   :  { %v160_v23 = vpop.f32.mrb[2].mxu0 }
 0x11e   :  { %vm163_vm1 = vcmp.gt.f32.partialorder %v158_v21, 0.0  ;;  %v164_v24 = vmul.f32 0.2, %v158_v21  ;;  %v354_v25 = vpop.f32.mrb[3].mxu0 }
 0x120   :  { %v165_v26 = vsel %vm163_vm1, %v158_v21, %v164_v24 }
 0x121   :  { %v166_v27 = vpack.c.bf16 %v165_v26, %v165_v26 }
 0x123   :  { %372 = vmatmul.mubr.bf16.vlgmr.msra.gmra.mrb[0].mxu1 %v166_v27 }
 0x1f6   :  { %v272_v29 = vpop.f32.mrb[0].mxu1 }
 0x1f7   :  { %v273_v30 = vadd.f32 %v308_v28, %v272_v29  ;;  %v373_v31 = vpop.f32.mrb[1].mxu1 }
 0x1f8   :  { %v275_v32 = vpop.f32.mrb[2].mxu1 }
 0x1f9   :  { %v278_v33 = vadd.f32 %v273_v30, %v50_v14  ;;  %v374_v34 = vpop.f32.mrb[3].mxu1 }
 0x1fb   :  { %v280_v35 = vmul.f32 0.2, %v278_v33  ;;  %vm279_vm2 = vcmp.gt.f32.partialorder %v278_v33, 0.0 }
 0x1fd   :  { %v281_v36 = vsel %vm279_vm2, %v278_v33, %v280_v35 }
 0x1fe   :  { %282 = vst [vmem:[#allocation7] sm:$0xff] %v281_v36 }
 0x1ff   :  { %453 = shalt.err (!%p450_p6)
}
 0x200   :  { %s454_s25 = scalar_lea.hbm %s557_s5, 128 }
 0x201   :  { %p455_p7 = scmp.ne.s32.totalorder %s557_s5, %s454_s25  ;;  %p458_p8 = scmp.lt.u32.totalorder %s454_s25, %s557_s5 }
 0x203   :  { %p460_p9 = pnand %p458_p8, %p455_p7 }
 0x205   :  { %463 = shalt.err (!%p460_p9)
}
 0x206   :  { %292 = dma.vmem_to_hbm [thread:$0]  %s290_s22, 128, %s557_s5, [#allocation4]  }
 0x207   :  { %468 = dma.done.wait [#allocation4], 128  }
 0x208   :  { %469 = vsyncadd [#allocation4], 4294967168 }
 0x209   :  { %296 = vsyncpa [#allocation3], 1 }
 0x20a   :  { %297 = vsyncpa [#allocation6], 1 }
 0x20b   :  { %298 = vsyncpa [#allocation4], 1 }

</bundles_post_ra>
